<compile_context>
chip_gen: v7x
topology: tpu7x:2x2x1
jax: 0.10.0
libtpu: 0.0.40
codegen_flags: <defaults>
</compile_context>

<pallas_src>
import functools

import jax
import jax.numpy as jnp
from jax.experimental import pallas as pl
from jax.experimental.pallas import tpu as pltpu


COMPUTE_DTYPE = jnp.bfloat16   # MXU-native operand dtype; accumulation is f32


# ----------------------------- Pallas kernels ------------------------------

def _mm_bias_act_kernel(x_ref, w_ref, b_ref, o_ref, acc_ref, *, relu):
    # y = act(x @ w_scaled + bias); K is the trailing reduction grid axis.
    kk = pl.program_id(2)

    @pl.when(kk == 0)
    def _():
        acc_ref[...] = jnp.zeros_like(acc_ref)

    acc_ref[...] += jnp.dot(x_ref[...], w_ref[...],
                            preferred_element_type=jnp.float32)

    @pl.when(kk == pl.num_programs(2) - 1)
    def _():
        y = acc_ref[...] + b_ref[...]
        if relu:
            y = jnp.maximum(y, 0.0)
        o_ref[...] = y.astype(o_ref.dtype)


def _mm_bias_add_relu_kernel(x_ref, w_ref, b_ref, r_ref, o_ref, acc_ref):
    # y = relu(x @ w_scaled + bias + residual)  -- conv3 + bn3 + skip + relu
    kk = pl.program_id(2)

    @pl.when(kk == 0)
    def _():
        acc_ref[...] = jnp.zeros_like(acc_ref)

    acc_ref[...] += jnp.dot(x_ref[...], w_ref[...],
                            preferred_element_type=jnp.float32)

    @pl.when(kk == pl.num_programs(2) - 1)
    def _():
        y = acc_ref[...] + b_ref[...] + r_ref[...].astype(jnp.float32)
        o_ref[...] = jnp.maximum(y, 0.0).astype(o_ref.dtype)


# ----------------------------- kernel wrapper -------------------------------

def _round_up(x, m):
    return ((x + m - 1) // m) * m


def _pick_tile(dim, target, multiple):
    """Largest tile <= target that is a multiple of `multiple` and divides dim,
    or the full dim (always a legal block)."""
    if dim <= target:
        return dim
    if dim % multiple != 0:
        return dim
    t = max(multiple, (target // multiple) * multiple)
    while dim % t != 0:
        t -= multiple
    return t


def matmul_bias_act(x, w, bias, residual=None, relu=True, out_dtype=None,
                    tm=512, tn=512, tk=512):
    """Fused x @ w + bias [+ residual] [ReLU].

    x, w (and residual) are expected in the bf16 compute dtype; bias is f32;
    accumulation is f32 in VMEM scratch; output dtype is `out_dtype`.
    """
    m, k = x.shape
    k2, n = w.shape
    assert k2 == k
    if out_dtype is None:
        out_dtype = x.dtype

    # ---- tile selection ----------------------------------------------------
    m8 = _round_up(m, 8)
    tm = min(tm, m8)
    while m8 % tm != 0:          # tm stays a multiple of 8 and divides m8
        tm -= 8
    # Keep at least 2 M-steps so v7x's two TensorCores can both get work.
    if m8 // tm < 2 and tm % 16 == 0 and m8 % (tm // 2) == 0:
        tm //= 2
    tn = _pick_tile(n, tn, 128)
    tk = _pick_tile(k, tk, 128)

    m_pad = m8
    xp = x if m == m_pad else jnp.pad(x, ((0, m_pad - m), (0, 0)))
    bias2 = bias.reshape(1, n).astype(jnp.float32)

    grid = (m_pad // tm, n // tn, k // tk)
    x_spec = pl.BlockSpec((tm, tk), lambda i, j, kk: (i, kk))
    w_spec = pl.BlockSpec((tk, tn), lambda i, j, kk: (kk, j))
    b_spec = pl.BlockSpec((1, tn), lambda i, j, kk: (0, j))
    o_spec = pl.BlockSpec((tm, tn), lambda i, j, kk: (i, j))
    out_shape = jax.ShapeDtypeStruct((m_pad, n), out_dtype)
    scratch = [pltpu.VMEM((tm, tn), jnp.float32)]
    cparams = pltpu.CompilerParams(
        dimension_semantics=("parallel", "parallel", "arbitrary"),
        vmem_limit_bytes=48 * 1024 * 1024)

    if residual is None:
        kern = functools.partial(_mm_bias_act_kernel, relu=relu)
        y = pl.pallas_call(
            kern,
            out_shape=out_shape,
            grid_spec=pltpu.PrefetchScalarGridSpec(
                num_scalar_prefetch=0,
                grid=grid,
                in_specs=[x_spec, w_spec, b_spec],
                out_specs=o_spec,
                scratch_shapes=scratch),
            compiler_params=cparams,
        )(xp, w, bias2)
    else:
        rp = residual if m == m_pad else jnp.pad(residual,
                                                 ((0, m_pad - m), (0, 0)))
        r_spec = pl.BlockSpec((tm, tn), lambda i, j, kk: (i, j))
        y = pl.pallas_call(
            _mm_bias_add_relu_kernel,
            out_shape=out_shape,
            grid_spec=pltpu.PrefetchScalarGridSpec(
                num_scalar_prefetch=0,
                grid=grid,
                in_specs=[x_spec, w_spec, b_spec, r_spec],
                out_specs=o_spec,
                scratch_shapes=scratch),
            compiler_params=cparams,
        )(xp, w, bias2, rp)

    return y if m == m_pad else y[:m]


# --------------------------- conv helpers (glue) ----------------------------

def fold_bn(gamma, beta, mean, var, eps=1e-5):
    scale = gamma / jnp.sqrt(var + eps)
    bias = beta - mean * scale
    return scale, bias


def conv1x1_bn(x_nhwc, w_oihw, scale, bias, stride=1, relu=True,
               out_dtype=COMPUTE_DTYPE):
    if stride > 1:
        x_nhwc = x_nhwc[:, ::stride, ::stride, :]
    n, h, w, c = x_nhwc.shape
    cout = w_oihw.shape[0]
    # Fold BN scale into the weight columns; cast weight + activation to bf16.
    wm = (w_oihw[:, :, 0, 0].T * scale[None, :]).astype(COMPUTE_DTYPE)
    xm = x_nhwc.reshape(n * h * w, c).astype(COMPUTE_DTYPE)
    y = matmul_bias_act(xm, wm, bias, relu=relu, out_dtype=out_dtype)
    return y.reshape(n, h, w, cout)


def conv3x3_bn(x_nhwc, w_oihw, scale, bias, stride=1, relu=True,
               out_dtype=COMPUTE_DTYPE):
    # TODO(synk): im2col is still JAX-side glue (9x activation materialization
    # in bf16); in-kernel tap accumulation over a (kh, kw) reduction grid axis
    # would cut that HBM traffic further.
    n, h, w, c = x_nhwc.shape
    cout = w_oihw.shape[0]
    xp = jnp.pad(x_nhwc.astype(COMPUTE_DTYPE), ((0, 0), (1, 1), (1, 1), (0, 0)))
    ho = (h + 2 - 3) // stride + 1
    wo = (w + 2 - 3) // stride + 1
    cols = []
    for kh in range(3):
        for kw in range(3):
            cols.append(
                xp[:, kh:kh + (ho - 1) * stride + 1:stride,
                      kw:kw + (wo - 1) * stride + 1:stride, :])
    patches = jnp.concatenate(cols, axis=-1).reshape(n * ho * wo, 9 * c)
    wm = jnp.transpose(w_oihw, (2, 3, 1, 0)).reshape(9 * c, cout)  # (kH,kW,Cin)
    wm = (wm * scale[None, :]).astype(COMPUTE_DTYPE)
    y = matmul_bias_act(patches, wm, bias, relu=relu, out_dtype=out_dtype)
    return y.reshape(n, ho, wo, cout)


# ------------------------------- Bottleneck ---------------------------------

EXPANSION = 4


def init_params(key, in_planes, planes, stride):
    out_planes = EXPANSION * planes
    ks = jax.random.split(key, 12)

    def conv_w(k, cout, cin, kh, kw):
        return 0.1 * jax.random.normal(k, (cout, cin, kh, kw), jnp.float32)

    def bn_params(k, c):
        kg, kb, km, kv = jax.random.split(k, 4)
        gamma = 1.0 + 0.1 * jax.random.normal(kg, (c,), jnp.float32)
        beta = 0.05 * jax.random.normal(kb, (c,), jnp.float32)
        mean = 0.01 * jax.random.normal(km, (c,), jnp.float32)
        var = 1.0 + 0.1 * jax.random.uniform(kv, (c,), jnp.float32)
        return fold_bn(gamma, beta, mean, var)

    p = {}
    p["w1"] = conv_w(ks[0], planes, in_planes, 1, 1)
    p["s1"], p["b1"] = bn_params(ks[1], planes)
    p["w2"] = conv_w(ks[2], planes, planes, 3, 3)
    p["s2"], p["b2"] = bn_params(ks[3], planes)
    p["w3"] = conv_w(ks[4], out_planes, planes, 1, 1)
    p["s3"], p["b3"] = bn_params(ks[5], out_planes)
    if stride != 1 or in_planes != out_planes:
        p["w_sc"] = conv_w(ks[6], out_planes, in_planes, 1, 1)
        p["s_sc"], p["b_sc"] = bn_params(ks[7], out_planes)
    return p


def bottleneck_forward(x_nchw, p, stride):
    in_dtype = x_nchw.dtype
    x = jnp.transpose(x_nchw, (0, 2, 3, 1))  # NCHW -> NHWC (edge-only)

    # conv1 (1x1) + bn1 + relu, conv2 (3x3, stride) + bn2 + relu — bf16 between
    out = conv1x1_bn(x, p["w1"], p["s1"], p["b1"], stride=1, relu=True)
    out = conv3x3_bn(out, p["w2"], p["s2"], p["b2"], stride=stride, relu=True)

    if "w_sc" in p:
        sc = conv1x1_bn(x, p["w_sc"], p["s_sc"], p["b_sc"], stride=stride,
                        relu=False)
    else:
        sc = x.astype(COMPUTE_DTYPE)

    n, ho, wo, _ = out.shape
    cout = p["w3"].shape[0]
    w3m = (p["w3"][:, :, 0, 0].T * p["s3"][None, :]).astype(COMPUTE_DTYPE)
    out_flat = out.reshape(n * ho * wo, -1)
    sc_flat = sc.reshape(n * ho * wo, -1)
    # conv3 + bn3 + residual add + relu, fused in a single Pallas kernel.
    y = matmul_bias_act(out_flat, w3m, p["b3"], residual=sc_flat,
                        relu=True, out_dtype=in_dtype)
    y = y.reshape(n, ho, wo, cout)
    return jnp.transpose(y, (0, 3, 1, 2))  # NHWC -> NCHW


if __name__ == "__main__":
    key = jax.random.PRNGKey(0)
    kx, kp = jax.random.split(key)

    in_planes, planes, stride = 4, 4, 2
    x = jax.random.normal(kx, (2, in_planes, 16, 16), jnp.float32)
    params = init_params(kp, in_planes, planes, stride)

    y = bottleneck_forward(x, params, stride)
    jax.block_until_ready(y)

    assert y.shape == (2, EXPANSION * planes, 16 // stride, 16 // stride), y.shape
    assert y.dtype == x.dtype
    assert bool(jnp.all(y >= 0.0))  # final ReLU
    print("KERNEL_OK")
</pallas_src>

<mosaic_0001>
module attributes {stable_mosaic.version = 11 : i64} {
  func.func @_mm_bias_act_kernel(%arg0: i32, %arg1: i32, %arg2: i32, %arg3: memref<256x4xbf16, #tpu.memory_space<vmem>>, %arg4: memref<4x4xbf16, #tpu.memory_space<vmem>>, %arg5: memref<1x4xf32, #tpu.memory_space<vmem>>, %arg6: memref<256x4xbf16, #tpu.memory_space<vmem>>, %arg7: memref<256x4xf32, #tpu.memory_space<vmem>>) attributes {dimension_semantics = [#tpu.dimension_semantics<parallel>, #tpu.dimension_semantics<parallel>, #tpu.dimension_semantics<arbitrary>], iteration_bounds = array<i64: 2, 1, 1>, scalar_prefetch = 0 : i64, scratch_operands = 1 : i64, tpu.core_type = #tpu.core_type<tc>, window_params = [{transform_indices = @transform_0, window_bounds = array<i64: 256, 4>}, {transform_indices = @transform_1, window_bounds = array<i64: 4, 4>}, {transform_indices = @transform_2, window_bounds = array<i64: 1, 4>}, {transform_indices = @transform_3, window_bounds = array<i64: 256, 4>}]} {
    %c0_i32 = arith.constant 0 : i32
    %0 = arith.cmpi eq, %arg2, %c0_i32 : i32
    %1 = arith.extui %0 : i1 to i32
    %c0_i32_0 = arith.constant 0 : i32
    %2 = arith.cmpi ne, %1, %c0_i32_0 : i32
    scf.if %2 {
      %cst_10 = arith.constant 0.000000e+00 : f32
      %12 = vector.broadcast %cst_10 : f32 to vector<256x4xf32>
      %c0_11 = arith.constant 0 : index
      %c0_12 = arith.constant 0 : index
      %13 = vector.load %arg7[%c0_11, %c0_12] : memref<256x4xf32, #tpu.memory_space<vmem>>, vector<256x4xf32>
      tpu.vector_store %arg7[%c0_11, %c0_12], %12 {strides = array<i32>} : memref<256x4xf32, #tpu.memory_space<vmem>>, vector<256x4xf32>,
    } else {
    }
    %c0 = arith.constant 0 : index
    %c0_1 = arith.constant 0 : index
    %3 = vector.load %arg7[%c0, %c0_1] : memref<256x4xf32, #tpu.memory_space<vmem>>, vector<256x4xf32>
    %c0_2 = arith.constant 0 : index
    %c0_3 = arith.constant 0 : index
    %4 = vector.load %arg3[%c0_2, %c0_3] : memref<256x4xbf16, #tpu.memory_space<vmem>>, vector<256x4xbf16>
    %c0_4 = arith.constant 0 : index
    %c0_5 = arith.constant 0 : index
    %5 = vector.load %arg4[%c0_4, %c0_5] : memref<4x4xbf16, #tpu.memory_space<vmem>>, vector<4x4xbf16>
    %cst = arith.constant dense<0.000000e+00> : vector<256x4xf32>
    %6 = tpu.matmul %4, %5, %cst {dimension_numbers = #tpu.dot_dimension_numbers<[1], [0], [0], [1], [0, 0, 1, 1], [], []>} : vector<256x4xbf16>, vector<4x4xbf16>, vector<256x4xf32> -> vector<256x4xf32>
    %7 = arith.addf %3, %6 : vector<256x4xf32>
    %c0_6 = arith.constant 0 : index
    %c0_7 = arith.constant 0 : index
    %8 = vector.load %arg7[%c0_6, %c0_7] : memref<256x4xf32, #tpu.memory_space<vmem>>, vector<256x4xf32>
    tpu.vector_store %arg7[%c0_6, %c0_7], %7 {strides = array<i32>} : memref<256x4xf32, #tpu.memory_space<vmem>>, vector<256x4xf32>,
    %c0_i32_8 = arith.constant 0 : i32
    %9 = arith.cmpi eq, %arg2, %c0_i32_8 : i32
    %10 = arith.extui %9 : i1 to i32
    %c0_i32_9 = arith.constant 0 : i32
    %11 = arith.cmpi ne, %10, %c0_i32_9 : i32
    scf.if %11 {
      %c0_10 = arith.constant 0 : index
      %c0_11 = arith.constant 0 : index
      %12 = vector.load %arg7[%c0_10, %c0_11] : memref<256x4xf32, #tpu.memory_space<vmem>>, vector<256x4xf32>
      %c0_12 = arith.constant 0 : index
      %c0_13 = arith.constant 0 : index
      %13 = vector.load %arg5[%c0_12, %c0_13] : memref<1x4xf32, #tpu.memory_space<vmem>>, vector<1x4xf32>
      %14 = vector.broadcast %13 : vector<1x4xf32> to vector<256x4xf32>
      %15 = arith.addf %12, %14 : vector<256x4xf32>
      %cst_14 = arith.constant 0.000000e+00 : f32
      %16 = vector.broadcast %cst_14 : f32 to vector<256x4xf32>
      %17 = arith.maximumf %15, %16 : vector<256x4xf32>
      %18 = arith.truncf %17 : vector<256x4xf32> to vector<256x4xbf16>
      %c0_15 = arith.constant 0 : index
      %c0_16 = arith.constant 0 : index
      %19 = vector.load %arg6[%c0_15, %c0_16] : memref<256x4xbf16, #tpu.memory_space<vmem>>, vector<256x4xbf16>
      tpu.vector_store %arg6[%c0_15, %c0_16], %18 {strides = array<i32>} : memref<256x4xbf16, #tpu.memory_space<vmem>>, vector<256x4xbf16>,
    } else {
    }
    return
  }
  func.func @transform_0(%arg0: i32, %arg1: i32, %arg2: i32) -> (i32, i32) {
    %c0_i32 = arith.constant 0 : i32
    return %arg0, %arg2 : i32, i32
  }
  func.func @transform_1(%arg0: i32, %arg1: i32, %arg2: i32) -> (i32, i32) {
    %c0_i32 = arith.constant 0 : i32
    return %arg2, %arg1 : i32, i32
  }
  func.func @transform_2(%arg0: i32, %arg1: i32, %arg2: i32) -> (i32, i32) {
    %c0_i32 = arith.constant 0 : i32
    %c0_i32_0 = arith.constant 0 : i32
    return %c0_i32, %arg1 : i32, i32
  }
  func.func @transform_3(%arg0: i32, %arg1: i32, %arg2: i32) -> (i32, i32) {
    %c0_i32 = arith.constant 0 : i32
    return %arg0, %arg1 : i32, i32
  }
}

</mosaic_0001>

<bundles_post_ra>
// kernel: tpu_custom_call.1
= control target key start
LH: loop header
LB: loop body
LE: loop exit
PB: predicated region body
PF: predicated region fallthrough
CT: control target
= control target key end

     0   :  { %s1344_s12 = smov 0   ;;  %s1346_s13 = smov 0   ;;  %s1583_s0 = inlined_call_operand.vmem [shape: bf16[512,4], index: 0, kind: input, shape index: {}]   ;;  %s1584_s1 = inlined_call_operand.vmem [shape: bf16[4,4], index: 1, kind: input, shape index: {}]   ;;  %s1585_s2 = inlined_call_operand.vmem [shape: f32[1,4], index: 2, kind: input, shape index: {}]   ;;  %s1586_s3 = inlined_call_operand.vmem [shape: bf16[512,4], index: 3, kind: output, shape index: {}]  }
   0x1   :  { %s1348_s14 = smov 0  }
   0x2 LB: > { %s32_s15 = sadd.s32 1, %s1317_s13  ;;  %p1099_p0 = scmp.ge.s32.totalorder %s1321_s14, 1  ;;  %s1321_s14 = sphi %s1348_s14, %s13_s14   ;;  %s1317_s13 = sphi %s1346_s13, %s1589_s13   ;;  %s1313_s12 = sphi %s1344_s12, %s1588_s12  }
   0x3   : > { %p34_p1 = scmp.ge.s32.totalorder %s32_s15, 2  ;;  %p186_p2 = scmp.lt.s32.totalorder %s1321_s14, 3 }
   0x5   : > { %s1591_s15 = smov (%p34_p1, %s32_s15), 0  ;;  %p187_p3 = pnand %p1099_p0, %p186_p2 }
   0x6   : > { %v356_v0 = vld [vmem:[%s1584_s1] sm:$0x3] (!%p187_p3)  ;;  %vm486_vm0 = vcmask (!%p187_p3), 1041408   ;;  %s1100_s18 = sshll.u32 (!%p187_p3), %s1313_s12, 5  ;;  %vm259_vm1 = vcmask (!%p187_p3), 31744   ;;  %v1323_v2 = vmov (!%p187_p3), 0.0  }
   0x7   : > { %190 = sbr.rel (%p187_p3) target bundleno = 281 (0x119), region = 32  ;;  %1256 = vmatprep.subr.msk.bf16.mxu0 (!%p187_p3), %vm486_vm0, %v356_v0  ;;  %1257 = vmatprep.subr.msk.bf16.mxu1 (!%p187_p3), %vm486_vm0, %v356_v0  ;;  %v488_v1 = vsel (!%p187_p3), %vm486_vm0, %v356_v0, 0  ;;  %p1370_p4 = scmp.lt.s32.totalorder (!%p187_p3), %s1100_s18, 63  ;;  %262 = vst.msk [vmem:[#allocation2 + $0x10] sm:$0xff] (!%p187_p3), %vm259_vm1, %v1323_v2  ;;  %260 = vst.msk [vmem:[#allocation2] sm:$0xff] (!%p187_p3), %vm259_vm1, %v1323_v2  ;;  %vm949_vm2 = vcmask (!%p187_p3), 27648  }
   0x8   : > { %261 = vst.msk [vmem:[#allocation2 + $0x8] sm:$0xff] (!%p187_p3), %vm259_vm1, %v1323_v2  ;;  %263 = vst.msk [vmem:[#allocation2 + $0x18] sm:$0xff] (!%p187_p3), %vm259_vm1, %v1323_v2  ;;  %1221 = vmatpush3.bf16.msra.mxu0 (!%p187_p3), %v488_v1  ;;  %1255 = vmatpush3.bf16.msra.mxu1 (!%p187_p3), %v488_v1  ;;  %v1445_v46 = vld [vmem:[%s1585_s2] ss:$0 sm:$0xff] (!%p187_p3) }
   0x9   : > { %264 = vst.msk [vmem:[#allocation2 + $0x20] sm:$0xff] (!%p187_p3), %vm259_vm1, %v1323_v2  ;;  %265 = vst.msk [vmem:[#allocation2 + $0x28] sm:$0xff] (!%p187_p3), %vm259_vm1, %v1323_v2 }
   0xa   : > { %266 = vst.msk [vmem:[#allocation2 + $0x30] sm:$0xff] (!%p187_p3), %vm259_vm1, %v1323_v2  ;;  %267 = vst.msk [vmem:[#allocation2 + $0x38] sm:$0xff] (!%p187_p3), %vm259_vm1, %v1323_v2 }
   0xb   : > { %268 = vst.msk [vmem:[#allocation2 + $0x40] sm:$0xff] (!%p187_p3), %vm259_vm1, %v1323_v2  ;;  %269 = vst.msk [vmem:[#allocation2 + $0x48] sm:$0xff] (!%p187_p3), %vm259_vm1, %v1323_v2 }
   0xc   : > { %270 = vst.msk [vmem:[#allocation2 + $0x50] sm:$0xff] (!%p187_p3), %vm259_vm1, %v1323_v2  ;;  %271 = vst.msk [vmem:[#allocation2 + $0x58] sm:$0xff] (!%p187_p3), %vm259_vm1, %v1323_v2 }
   0xd   : > { %272 = vst.msk [vmem:[#allocation2 + $0x60] sm:$0xff] (!%p187_p3), %vm259_vm1, %v1323_v2  ;;  %273 = vst.msk [vmem:[#allocation2 + $0x68] sm:$0xff] (!%p187_p3), %vm259_vm1, %v1323_v2 }
   0xe   : > { %274 = vst.msk [vmem:[#allocation2 + $0x70] sm:$0xff] %vm259_vm1, %v1323_v2  ;;  %275 = vst.msk [vmem:[#allocation2 + $0x78] sm:$0xff] %vm259_vm1, %v1323_v2  ;;  %s1593_s18 = smov (!%p1370_p4, %s1100_s18), 63  ;;  %v294_v19 = vld [vmem:[#allocation2 + $0x10] sm:$0xff]  ;;  %v292_v21 = vld [vmem:[#allocation2] sm:$0xff] }
   0xf   : > { %276 = vst.msk [vmem:[#allocation2 + $0x80] sm:$0xff] %vm259_vm1, %v1323_v2  ;;  %277 = vst.msk [vmem:[#allocation2 + $0x88] sm:$0xff] %vm259_vm1, %v1323_v2  ;;  %s1101_s20 = sshll.u32 %s1593_s18, 2  ;;  %v295_v24 = vld [vmem:[#allocation2 + $0x18] sm:$0xff]  ;;  %v293_v29 = vld [vmem:[#allocation2 + $0x8] sm:$0xff] }
  0x10   : > { %278 = vst.msk [vmem:[#allocation2 + $0x90] sm:$0xff] %vm259_vm1, %v1323_v2  ;;  %279 = vst.msk [vmem:[#allocation2 + $0x98] sm:$0xff] %vm259_vm1, %v1323_v2  ;;  %s233_s23 = scalar_lea.vmem %s1583_s0, %s1101_s20  ;;  %v296_v45 = vld [vmem:[#allocation2 + $0x20] sm:$0xff]  ;;  %v297_v54 = vld [vmem:[#allocation2 + $0x28] sm:$0xff]  ;;  %s1462_s28 = scalar_lea.vmem %s1586_s3, %s1101_s20 }
  0x11   : > { %280 = vst.msk [vmem:[#allocation2 + $0xa0] sm:$0xff] %vm259_vm1, %v1323_v2  ;;  %281 = vst.msk [vmem:[#allocation2 + $0xa8] sm:$0xff] %vm259_vm1, %v1323_v2  ;;  %v1283_v3 = vld [vmem:[%s233_s23] sm:$0xff]   ;;  %v1285_v5 = vld [vmem:[%s233_s23 + $0x8] sm:$0xff]  }
  0x12   : > { %282 = vst.msk [vmem:[#allocation2 + $0xb0] sm:$0xff] %vm259_vm1, %v1323_v2  ;;  %283 = vst.msk [vmem:[#allocation2 + $0xb8] sm:$0xff] %vm259_vm1, %v1323_v2  ;;  %v1284_v4 = vld [vmem:[%s233_s23 + $0x40] sm:$0xff]   ;;  %1222 = vmatprep.mubr.msk.bf16.mxu0 %vm259_vm1, %v1283_v3  ;;  %v1286_v6 = vld [vmem:[%s233_s23 + $0x48] sm:$0xff]  }
  0x13   : > { %284 = vst.msk [vmem:[#allocation2 + $0xc0] sm:$0xff] %vm259_vm1, %v1323_v2  ;;  %285 = vst.msk [vmem:[#allocation2 + $0xc8] sm:$0xff] %vm259_vm1, %v1323_v2  ;;  %1238 = vmatprep.mubr.msk.bf16.mxu1 %vm259_vm1, %v1284_v4  ;;  %1223 = vmatmul.mubr.msk.bf16.vlgmr.msra.gmra.mrb[0].mxu0 %vm259_vm1, %v1285_v5  ;;  %v1287_v7 = vld [vmem:[%s233_s23 + $0x10] sm:$0xff]   ;;  %v1289_v9 = vld [vmem:[%s233_s23 + $0x18] sm:$0xff]  }
  0x14   : > { %286 = vst.msk [vmem:[#allocation2 + $0xd0] sm:$0xff] %vm259_vm1, %v1323_v2  ;;  %287 = vst.msk [vmem:[#allocation2 + $0xd8] sm:$0xff] %vm259_vm1, %v1323_v2  ;;  %1239 = vmatmul.mubr.msk.bf16.vlgmr.msra.gmra.mrb[0].mxu1 %vm259_vm1, %v1286_v6  ;;  %v1288_v8 = vld [vmem:[%s233_s23 + $0x50] sm:$0xff]   ;;  %1226 = vmatprep.mubr.msk.bf16.mxu0 %vm259_vm1, %v1287_v7  ;;  %v1290_v10 = vld [vmem:[%s233_s23 + $0x58] sm:$0xff]  }
  0x15   : > { %288 = vst.msk [vmem:[#allocation2 + $0xe0] sm:$0xff] %vm259_vm1, %v1323_v2  ;;  %289 = vst.msk [vmem:[#allocation2 + $0xe8] sm:$0xff] %vm259_vm1, %v1323_v2  ;;  %1242 = vmatprep.mubr.msk.bf16.mxu1 %vm259_vm1, %v1288_v8  ;;  %v1291_v11 = vld [vmem:[%s233_s23 + $0x20] sm:$0xff]   ;;  %v1293_v13 = vld [vmem:[%s233_s23 + $0x28] sm:$0xff]  }
  0x16   : > { %290 = vst.msk [vmem:[#allocation2 + $0xf0] sm:$0xff] %vm259_vm1, %v1323_v2  ;;  %291 = vst.msk [vmem:[#allocation2 + $0xf8] sm:$0xff] %vm259_vm1, %v1323_v2  ;;  %v1292_v12 = vld [vmem:[%s233_s23 + $0x60] sm:$0xff]   ;;  %v1294_v14 = vld [vmem:[%s233_s23 + $0x68] sm:$0xff]  }
  0x17   : > { %v1295_v15 = vld [vmem:[%s233_s23 + $0x30] sm:$0xff]   ;;  %v1297_v17 = vld [vmem:[%s233_s23 + $0x38] sm:$0xff]   ;;  %v308_v23 = vld [vmem:[#allocation2 + $0x80] sm:$0xff] }
  0x18   : > { %v1296_v16 = vld [vmem:[%s233_s23 + $0x70] sm:$0xff]   ;;  %v1298_v18 = vld [vmem:[%s233_s23 + $0x78] sm:$0xff]   ;;  %v309_v34 = vld [vmem:[#allocation2 + $0x88] sm:$0xff] }
  0x19   : > { %v310_v20 = vld [vmem:[#allocation2 + $0x90] sm:$0xff]  ;;  %v311_v28 = vld [vmem:[#allocation2 + $0x98] sm:$0xff]  ;;  %v312_v48 = vld [vmem:[#allocation2 + $0xa0] sm:$0xff] }
  0x1a   : > { %v298_v43 = vld [vmem:[#allocation2 + $0x30] sm:$0xff]  ;;  %v299_v49 = vld [vmem:[#allocation2 + $0x38] sm:$0xff]  ;;  %v313_v60 = vld [vmem:[#allocation2 + $0xa8] sm:$0xff] }
  0x1b   : > { %1227 = vmatmul.mubr.msk.bf16.gmra.mrb[4].mxu0 %vm259_vm1, %v1289_v9  ;;  %v314_v44 = vld [vmem:[#allocation2 + $0xb0] sm:$0xff]  ;;  %v315_v53 = vld [vmem:[#allocation2 + $0xb8] sm:$0xff] }
  0x1c   : > { %1243 = vmatmul.mubr.msk.bf16.gmra.mrb[4].mxu1 %vm259_vm1, %v1290_v10  ;;  %1230 = vmatprep.mubr.msk.bf16.mxu0 %vm259_vm1, %v1291_v11 }
  0x1d   : > { %1246 = vmatprep.mubr.msk.bf16.mxu1 %vm259_vm1, %v1292_v12 }
  0x23   : > { %1231 = vmatmul.mubr.msk.bf16.gmra.mrb[8].mxu0 %vm259_vm1, %v1293_v13 }
  0x24   : > { %1247 = vmatmul.mubr.msk.bf16.gmra.mrb[8].mxu1 %vm259_vm1, %v1294_v14  ;;  %1234 = vmatprep.mubr.msk.bf16.mxu0 %vm259_vm1, %v1295_v15 }
  0x25   : > { %1250 = vmatprep.mubr.msk.bf16.mxu1 %vm259_vm1, %v1296_v16 }
  0x2b   : > { %1235 = vmatmul.mubr.msk.bf16.gmra.mrb[12].mxu0 %vm259_vm1, %v1297_v17 }
  0x2c   : > { %1251 = vmatmul.mubr.msk.bf16.gmra.mrb[12].mxu1 %vm259_vm1, %v1298_v18 }
  0xe6   : > { %v1224_v22 = vpop.f32.mrb[0].mxu0 }
  0xe7   : > { %v653_v25 = vadd.f32 %v1224_v22, %v294_v19  ;;  %v1240_v26 = vpop.f32.mrb[0].mxu1  ;;  %v524_v27 = vpop.f32.mrb[1].mxu0  ;;  %v302_v22 = vld [vmem:[#allocation2 + $0x50] sm:$0xff] }
  0xe8   : > { %v669_v30 = vadd.f32 %v1240_v26, %v310_v20  ;;  %v651_v31 = vadd.f32 %v524_v27, %v292_v21  ;;  %v588_v32 = vpop.f32.mrb[1].mxu1  ;;  %v1225_v33 = vpop.f32.mrb[2].mxu0  ;;  %v318_v27 = vld [vmem:[#allocation2 + $0xd0] sm:$0xff] }
  0xe9   : > { %685 = vst.msk [vmem:[#allocation2 + $0x10] sm:$0xff] %vm259_vm1, %v653_v25  ;;  %v667_v35 = vadd.f32 %v588_v32, %v308_v23  ;;  %v654_v36 = vadd.f32 %v1225_v33, %v295_v24  ;;  %v1241_v37 = vpop.f32.mrb[2].mxu1  ;;  %v527_v38 = vpop.f32.mrb[3].mxu0 }
  0xea   : > { %701 = vst.msk [vmem:[#allocation2 + $0x90] sm:$0xff] %vm259_vm1, %v669_v30  ;;  %683 = vst.msk [vmem:[#allocation2] sm:$0xff] %vm259_vm1, %v651_v31  ;;  %v670_v39 = vadd.f32 %v1241_v37, %v311_v28  ;;  %v652_v40 = vadd.f32 %v527_v38, %v293_v29  ;;  %v591_v41 = vpop.f32.mrb[3].mxu1  ;;  %v300_v28 = vld [vmem:[#allocation2 + $0x40] sm:$0xff] }
  0xeb   : > { %699 = vst.msk [vmem:[#allocation2 + $0x80] sm:$0xff] %vm259_vm1, %v667_v35  ;;  %686 = vst.msk [vmem:[#allocation2 + $0x18] sm:$0xff] %vm259_vm1, %v654_v36  ;;  %v668_v42 = vadd.f32 %v591_v41, %v309_v34  ;;  %v316_v34 = vld [vmem:[#allocation2 + $0xc0] sm:$0xff]  ;;  %v303_v35 = vld [vmem:[#allocation2 + $0x58] sm:$0xff] }
  0xec   : > { %702 = vst.msk [vmem:[#allocation2 + $0x98] sm:$0xff] %vm259_vm1, %v670_v39  ;;  %684 = vst.msk [vmem:[#allocation2 + $0x8] sm:$0xff] %vm259_vm1, %v652_v40 }
  0xed   : > { %700 = vst.msk [vmem:[#allocation2 + $0x88] sm:$0xff] %vm259_vm1, %v668_v42  ;;  %v319_v42 = vld [vmem:[#allocation2 + $0xd8] sm:$0xff] }
  0xee   : > { %v1228_v47 = vpop.f32.mrb[4].mxu0 }
  0xef   : > { %v657_v50 = vadd.f32 %v1228_v47, %v298_v43  ;;  %v1244_v51 = vpop.f32.mrb[4].mxu1  ;;  %v540_v52 = vpop.f32.mrb[5].mxu0  ;;  %v301_v43 = vld [vmem:[#allocation2 + $0x48] sm:$0xff] }
  0xf0   : > { %v720_v55 = vld [vmem:[#allocation2 + $0x10] sm:$0xff]  ;;  %v673_v56 = vadd.f32 %v1244_v51, %v314_v44  ;;  %v655_v57 = vadd.f32 %v540_v52, %v296_v45  ;;  %v604_v58 = vpop.f32.mrb[5].mxu1  ;;  %v1229_v59 = vpop.f32.mrb[6].mxu0  ;;  %v317_v52 = vld [vmem:[#allocation2 + $0xc8] sm:$0xff] }
  0xf1   : > { %v759_v61 = vadd.f32 %v1445_v46, %v720_v55  ;;  %v736_v62 = vld [vmem:[#allocation2 + $0x90] sm:$0xff]  ;;  %v718_v63 = vld [vmem:[#allocation2] sm:$0xff]  ;;  %689 = vst.msk [vmem:[#allocation2 + $0x30] sm:$0xff] %vm259_vm1, %v657_v50  ;;  %v671_v0 = vadd.f32 %v604_v58, %v312_v48  ;;  %v658_v1 = vadd.f32 %v1229_v59, %v299_v49  ;;  %v1245_v2 = vpop.f32.mrb[6].mxu1  ;;  %v543_v3 = vpop.f32.mrb[7].mxu0 }
  0xf2   : > { %v775_v4 = vadd.f32 %v1445_v46, %v736_v62  ;;  %v757_v5 = vadd.f32 %v1445_v46, %v718_v63  ;;  %v734_v6 = vld [vmem:[#allocation2 + $0x80] sm:$0xff]  ;;  %v721_v7 = vld [vmem:[#allocation2 + $0x18] sm:$0xff]  ;;  %705 = vst.msk [vmem:[#allocation2 + $0xb0] sm:$0xff] %vm259_vm1, %v673_v56  ;;  %687 = vst.msk [vmem:[#allocation2 + $0x20] sm:$0xff] %vm259_vm1, %v655_v57  ;;  %v674_v8 = vadd.f32 %v1245_v2, %v315_v53  ;;  %v607_v10 = vpop.f32.mrb[7].mxu1 }
  0xf3   : > { %v656_v9 = vadd.f32 %v543_v3, %v297_v54  ;;  %v791_v11 = vmax.f32 %v759_v61, 0.0  ;;  %v773_v12 = vadd.f32 %v1445_v46, %v734_v6  ;;  %v760_v13 = vadd.f32 %v1445_v46, %v721_v7  ;;  %v737_v14 = vld [vmem:[#allocation2 + $0x98] sm:$0xff]  ;;  %v719_v15 = vld [vmem:[#allocation2 + $0x8] sm:$0xff]  ;;  %703 = vst.msk [vmem:[#allocation2 + $0xa0] sm:$0xff] %vm259_vm1, %v671_v0  ;;  %690 = vst.msk [vmem:[#allocation2 + $0x38] sm:$0xff] %vm259_vm1, %v658_v1 }
  0xf4   : > { %v672_v16 = vadd.f32 %v607_v10, %v313_v60  ;;  %v807_v17 = vmax.f32 %v775_v4, 0.0  ;;  %v789_v18 = vmax.f32 %v757_v5, 0.0  ;;  %v776_v19 = vadd.f32 %v1445_v46, %v737_v14  ;;  %v735_v21 = vld [vmem:[#allocation2 + $0x88] sm:$0xff]  ;;  %706 = vst.msk [vmem:[#allocation2 + $0xb8] sm:$0xff] %vm259_vm1, %v674_v8 }
  0xf5   : > { %v758_v20 = vadd.f32 %v1445_v46, %v719_v15  ;;  %688 = vst.msk [vmem:[#allocation2 + $0x28] sm:$0xff] %vm259_vm1, %v656_v9  ;;  %v1173_v23 = vpack.c.bf16 %v791_v11, %v791_v11  ;;  %v805_v24 = vmax.f32 %v773_v12, 0.0  ;;  %v792_v25 = vmax.f32 %v760_v13, 0.0  ;;  %v306_v15 = vld [vmem:[#allocation2 + $0x70] sm:$0xff] }
  0xf6   : > { %v774_v26 = vadd.f32 %v1445_v46, %v735_v21  ;;  %704 = vst.msk [vmem:[#allocation2 + $0xa8] sm:$0xff] %vm259_vm1, %v672_v16  ;;  %v1189_v29 = vpack.c.bf16 %v807_v17, %v807_v17  ;;  %v1171_v30 = vpack.c.bf16 %v789_v18, %v789_v18  ;;  %v808_v31 = vmax.f32 %v776_v19, 0.0  ;;  %v1232_v33 = vpop.f32.mrb[8].mxu0  ;;  %v304_v21 = vld [vmem:[#allocation2 + $0x60] sm:$0xff] }
  0xf7   : > { %v790_v32 = vmax.f32 %v758_v20, 0.0  ;;  %952 = vst.msk [vmem:[%s1462_s28 + $0x8] sm:$0xf] %vm949_vm2, %v1173_v23  ;;  %v1187_v36 = vpack.c.bf16 %v805_v24, %v805_v24  ;;  %v1174_v37 = vpack.c.bf16 %v792_v25, %v792_v25  ;;  %v661_v39 = vadd.f32 %v1232_v33, %v302_v22  ;;  %v1248_v40 = vpop.f32.mrb[8].mxu1  ;;  %v556_v41 = vpop.f32.mrb[9].mxu0  ;;  %v322_v20 = vld [vmem:[#allocation2 + $0xf0] sm:$0xff] }
  0xf8   : > { %v806_v38 = vmax.f32 %v774_v26, 0.0  ;;  %968 = vst.msk [vmem:[%s1462_s28 + $0x48] sm:$0xf] %vm949_vm2, %v1189_v29  ;;  %950 = vst.msk [vmem:[%s1462_s28] sm:$0xf] %vm949_vm2, %v1171_v30  ;;  %v1190_v44 = vpack.c.bf16 %v808_v31, %v808_v31  ;;  %v724_v47 = vld [vmem:[#allocation2 + $0x30] sm:$0xff]  ;;  %v677_v48 = vadd.f32 %v1248_v40, %v318_v27  ;;  %v659_v49 = vadd.f32 %v556_v41, %v300_v28 }
  0xf9   : > { %v1172_v45 = vpack.c.bf16 %v790_v32, %v790_v32  ;;  %v620_v50 = vpop.f32.mrb[9].mxu1  ;;  %v1233_v51 = vpop.f32.mrb[10].mxu0  ;;  %966 = vst.msk [vmem:[%s1462_s28 + $0x40] sm:$0xf] %vm949_vm2, %v1187_v36  ;;  %953 = vst.msk [vmem:[%s1462_s28 + $0xc] sm:$0xf] %vm949_vm2, %v1174_v37  ;;  %v763_v54 = vadd.f32 %v1445_v46, %v724_v47 }
  0xfa   : > { %v1188_v53 = vpack.c.bf16 %v806_v38, %v806_v38  ;;  %v740_v55 = vld [vmem:[#allocation2 + $0xb0] sm:$0xff]  ;;  %v722_v56 = vld [vmem:[#allocation2 + $0x20] sm:$0xff]  ;;  %693 = vst.msk [vmem:[#allocation2 + $0x50] sm:$0xff] %vm259_vm1, %v661_v39  ;;  %v675_v57 = vadd.f32 %v620_v50, %v316_v34  ;;  %v662_v58 = vadd.f32 %v1233_v51, %v303_v35  ;;  %v1249_v59 = vpop.f32.mrb[10].mxu1  ;;  %v559_v60 = vpop.f32.mrb[11].mxu0  ;;  %v725_v0 = vld [vmem:[#allocation2 + $0x38] sm:$0xff] }
  0xfb   : > { %969 = vst.msk [vmem:[%s1462_s28 + $0x4c] sm:$0xf] %vm949_vm2, %v1190_v44  ;;  %951 = vst.msk [vmem:[%s1462_s28 + $0x4] sm:$0xf] %vm949_vm2, %v1172_v45  ;;  %v779_v61 = vadd.f32 %v1445_v46, %v740_v55  ;;  %v761_v62 = vadd.f32 %v1445_v46, %v722_v56  ;;  %v738_v63 = vld [vmem:[#allocation2 + $0xa0] sm:$0xff]  ;;  %v678_v1 = vadd.f32 %v1249_v59, %v319_v42  ;;  %v623_v3 = vpop.f32.mrb[11].mxu1 }
  0xfc   : > { %709 = vst.msk [vmem:[#allocation2 + $0xd0] sm:$0xff] %vm259_vm1, %v677_v48  ;;  %691 = vst.msk [vmem:[#allocation2 + $0x40] sm:$0xff] %vm259_vm1, %v659_v49  ;;  %v660_v2 = vadd.f32 %v559_v60, %v301_v43  ;;  %v795_v4 = vmax.f32 %v763_v54, 0.0  ;;  %v777_v5 = vadd.f32 %v1445_v46, %v738_v63  ;;  %v764_v6 = vadd.f32 %v1445_v46, %v725_v0  ;;  %v741_v7 = vld [vmem:[#allocation2 + $0xb8] sm:$0xff]  ;;  %v723_v8 = vld [vmem:[#allocation2 + $0x28] sm:$0xff] }
  0xfd   : > { %967 = vst.msk [vmem:[%s1462_s28 + $0x44] sm:$0xf] %vm949_vm2, %v1188_v53  ;;  %v676_v9 = vadd.f32 %v623_v3, %v317_v52  ;;  %v811_v10 = vmax.f32 %v779_v61, 0.0  ;;  %v793_v11 = vmax.f32 %v761_v62, 0.0  ;;  %v780_v12 = vadd.f32 %v1445_v46, %v741_v7  ;;  %v739_v14 = vld [vmem:[#allocation2 + $0xa8] sm:$0xff]  ;;  %v320_v27 = vld [vmem:[#allocation2 + $0xe0] sm:$0xff] }
  0xfe   : > { %707 = vst.msk [vmem:[#allocation2 + $0xc0] sm:$0xff] %vm259_vm1, %v675_v57  ;;  %694 = vst.msk [vmem:[#allocation2 + $0x58] sm:$0xff] %vm259_vm1, %v662_v58  ;;  %v762_v13 = vadd.f32 %v1445_v46, %v723_v8  ;;  %v1177_v16 = vpack.c.bf16 %v795_v4, %v795_v4  ;;  %v809_v17 = vmax.f32 %v777_v5, 0.0  ;;  %v796_v18 = vmax.f32 %v764_v6, 0.0  ;;  %v1236_v26 = vpop.f32.mrb[12].mxu0  ;;  %v307_v28 = vld [vmem:[#allocation2 + $0x78] sm:$0xff] }
  0xff   : > { %710 = vst.msk [vmem:[#allocation2 + $0xd8] sm:$0xff] %vm259_vm1, %v678_v1  ;;  %692 = vst.msk [vmem:[#allocation2 + $0x48] sm:$0xff] %vm259_vm1, %v660_v2  ;;  %v778_v19 = vadd.f32 %v1445_v46, %v739_v14  ;;  %v1193_v22 = vpack.c.bf16 %v811_v10, %v811_v10  ;;  %v1175_v23 = vpack.c.bf16 %v793_v11, %v793_v11  ;;  %v812_v24 = vmax.f32 %v780_v12, 0.0  ;;  %v1252_v33 = vpop.f32.mrb[12].mxu1  ;;  %v572_v34 = vpop.f32.mrb[13].mxu0  ;;  %v323_v35 = vld [vmem:[#allocation2 + $0xf8] sm:$0xff] }
 0x100   : > { %708 = vst.msk [vmem:[#allocation2 + $0xc8] sm:$0xff] %vm259_vm1, %v676_v9  ;;  %v794_v25 = vmax.f32 %v762_v13, 0.0  ;;  %v1191_v29 = vpack.c.bf16 %v809_v17, %v809_v17  ;;  %v1178_v30 = vpack.c.bf16 %v796_v18, %v796_v18  ;;  %v665_v32 = vadd.f32 %v1236_v26, %v306_v15  ;;  %v305_v36 = vld [vmem:[#allocation2 + $0x68] sm:$0xff]  ;;  %v636_v42 = vpop.f32.mrb[13].mxu1  ;;  %v1237_v43 = vpop.f32.mrb[14].mxu0 }
 0x101   : > { %956 = vst.msk [vmem:[%s1462_s28 + $0x18] sm:$0xf] %vm949_vm2, %v1177_v16  ;;  %v810_v31 = vmax.f32 %v778_v19, 0.0  ;;  %972 = vst.msk [vmem:[%s1462_s28 + $0x58] sm:$0xf] %vm949_vm2, %v1193_v22  ;;  %v1194_v37 = vpack.c.bf16 %v812_v24, %v812_v24  ;;  %v728_v39 = vld [vmem:[#allocation2 + $0x50] sm:$0xff]  ;;  %v681_v40 = vadd.f32 %v1252_v33, %v322_v20  ;;  %v663_v41 = vadd.f32 %v572_v34, %v304_v21 }
 0x102   : > { %954 = vst.msk [vmem:[%s1462_s28 + $0x10] sm:$0xf] %vm949_vm2, %v1175_v23  ;;  %v1176_v38 = vpack.c.bf16 %v794_v25, %v794_v25  ;;  %v321_v44 = vld [vmem:[#allocation2 + $0xe8] sm:$0xff]  ;;  %970 = vst.msk [vmem:[%s1462_s28 + $0x50] sm:$0xf] %vm949_vm2, %v1191_v29  ;;  %v767_v47 = vadd.f32 %v1445_v46, %v728_v39  ;;  %v679_v50 = vadd.f32 %v636_v42, %v320_v27  ;;  %v1253_v52 = vpop.f32.mrb[14].mxu1 }
 0x103   : > { %957 = vst.msk [vmem:[%s1462_s28 + $0x1c] sm:$0xf] %vm949_vm2, %v1178_v30  ;;  %v1192_v45 = vpack.c.bf16 %v810_v31, %v810_v31  ;;  %v744_v48 = vld [vmem:[#allocation2 + $0xd0] sm:$0xff]  ;;  %v726_v49 = vld [vmem:[#allocation2 + $0x40] sm:$0xff]  ;;  %v666_v51 = vadd.f32 %v1237_v43, %v307_v28  ;;  %v575_v53 = vpop.f32.mrb[15].mxu0  ;;  %v682_v58 = vadd.f32 %v1253_v52, %v323_v35  ;;  %v639_v60 = vpop.f32.mrb[15].mxu1 }
 0x104   : > { %697 = vst.msk [vmem:[#allocation2 + $0x70] sm:$0xff] %vm259_vm1, %v665_v32  ;;  %v783_v54 = vadd.f32 %v1445_v46, %v744_v48  ;;  %v765_v55 = vadd.f32 %v1445_v46, %v726_v49  ;;  %713 = vst.msk [vmem:[#allocation2 + $0xf0] sm:$0xff] %vm259_vm1, %v681_v40  ;;  %v664_v59 = vadd.f32 %v575_v53, %v305_v36  ;;  %v799_v61 = vmax.f32 %v767_v47, 0.0 }
 0x105   : > { %973 = vst.msk [vmem:[%s1462_s28 + $0x5c] sm:$0xf] %vm949_vm2, %v1194_v37  ;;  %955 = vst.msk [vmem:[%s1462_s28 + $0x14] sm:$0xf] %vm949_vm2, %v1176_v38  ;;  %v742_v56 = vld [vmem:[#allocation2 + $0xc0] sm:$0xff]  ;;  %v729_v57 = vld [vmem:[#allocation2 + $0x58] sm:$0xff]  ;;  %v680_v2 = vadd.f32 %v639_v60, %v321_v44 }
 0x106   : > { %695 = vst.msk [vmem:[#allocation2 + $0x60] sm:$0xff] %vm259_vm1, %v663_v41  ;;  %v781_v62 = vadd.f32 %v1445_v46, %v742_v56  ;;  %v768_v63 = vadd.f32 %v1445_v46, %v729_v57  ;;  %v745_v0 = vld [vmem:[#allocation2 + $0xd8] sm:$0xff]  ;;  %v727_v1 = vld [vmem:[#allocation2 + $0x48] sm:$0xff]  ;;  %711 = vst.msk [vmem:[#allocation2 + $0xe0] sm:$0xff] %vm259_vm1, %v679_v50  ;;  %v815_v3 = vmax.f32 %v783_v54, 0.0  ;;  %v797_v4 = vmax.f32 %v765_v55, 0.0 }
 0x107   : > { %971 = vst.msk [vmem:[%s1462_s28 + $0x54] sm:$0xf] %vm949_vm2, %v1192_v45  ;;  %v784_v5 = vadd.f32 %v1445_v46, %v745_v0  ;;  %v766_v6 = vadd.f32 %v1445_v46, %v727_v1  ;;  %v743_v7 = vld [vmem:[#allocation2 + $0xc8] sm:$0xff]  ;;  %v1181_v8 = vpack.c.bf16 %v799_v61, %v799_v61 }
 0x108   : > { %698 = vst.msk [vmem:[#allocation2 + $0x78] sm:$0xff] %vm259_vm1, %v666_v51  ;;  %714 = vst.msk [vmem:[#allocation2 + $0xf8] sm:$0xff] %vm259_vm1, %v682_v58  ;;  %v813_v9 = vmax.f32 %v781_v62, 0.0  ;;  %v800_v10 = vmax.f32 %v768_v63, 0.0  ;;  %v782_v11 = vadd.f32 %v1445_v46, %v743_v7  ;;  %v1197_v12 = vpack.c.bf16 %v815_v3, %v815_v3 }
 0x109   : > { %696 = vst.msk [vmem:[#allocation2 + $0x68] sm:$0xff] %vm259_vm1, %v664_v59  ;;  %712 = vst.msk [vmem:[#allocation2 + $0xe8] sm:$0xff] %vm259_vm1, %v680_v2  ;;  %v1179_v13 = vpack.c.bf16 %v797_v4, %v797_v4  ;;  %v816_v14 = vmax.f32 %v784_v5, 0.0  ;;  %v798_v15 = vmax.f32 %v766_v6, 0.0 }
 0x10a   : > { %960 = vst.msk [vmem:[%s1462_s28 + $0x28] sm:$0xf] %vm949_vm2, %v1181_v8  ;;  %v1195_v16 = vpack.c.bf16 %v813_v9, %v813_v9  ;;  %v1182_v17 = vpack.c.bf16 %v800_v10, %v800_v10  ;;  %v814_v18 = vmax.f32 %v782_v11, 0.0  ;;  %976 = vst.msk [vmem:[%s1462_s28 + $0x68] sm:$0xf] %vm949_vm2, %v1197_v12 }
 0x10b   : > { %958 = vst.msk [vmem:[%s1462_s28 + $0x20] sm:$0xf] %vm949_vm2, %v1179_v13  ;;  %v1198_v19 = vpack.c.bf16 %v816_v14, %v816_v14  ;;  %v1180_v20 = vpack.c.bf16 %v798_v15, %v798_v15  ;;  %v732_v21 = vld [vmem:[#allocation2 + $0x70] sm:$0xff] }
 0x10c   : > { %974 = vst.msk [vmem:[%s1462_s28 + $0x60] sm:$0xf] %vm949_vm2, %v1195_v16  ;;  %961 = vst.msk [vmem:[%s1462_s28 + $0x2c] sm:$0xf] %vm949_vm2, %v1182_v17  ;;  %v1196_v22 = vpack.c.bf16 %v814_v18, %v814_v18  ;;  %v771_v23 = vadd.f32 %v1445_v46, %v732_v21  ;;  %v748_v24 = vld [vmem:[#allocation2 + $0xf0] sm:$0xff] }
 0x10d   : > { %v730_v25 = vld [vmem:[#allocation2 + $0x60] sm:$0xff]  ;;  %977 = vst.msk [vmem:[%s1462_s28 + $0x6c] sm:$0xf] %vm949_vm2, %v1198_v19  ;;  %959 = vst.msk [vmem:[%s1462_s28 + $0x24] sm:$0xf] %vm949_vm2, %v1180_v20  ;;  %v787_v26 = vadd.f32 %v1445_v46, %v748_v24 }
 0x10e   : > { %v769_v27 = vadd.f32 %v1445_v46, %v730_v25  ;;  %v746_v28 = vld [vmem:[#allocation2 + $0xe0] sm:$0xff]  ;;  %975 = vst.msk [vmem:[%s1462_s28 + $0x64] sm:$0xf] %vm949_vm2, %v1196_v22  ;;  %v803_v30 = vmax.f32 %v771_v23, 0.0 }
 0x10f   : > { %v733_v29 = vld [vmem:[#allocation2 + $0x78] sm:$0xff]  ;;  %v785_v31 = vadd.f32 %v1445_v46, %v746_v28  ;;  %v819_v35 = vmax.f32 %v787_v26, 0.0 }
 0x110   : > { %v772_v32 = vadd.f32 %v1445_v46, %v733_v29  ;;  %v749_v33 = vld [vmem:[#allocation2 + $0xf8] sm:$0xff]  ;;  %v731_v34 = vld [vmem:[#allocation2 + $0x68] sm:$0xff]  ;;  %v801_v36 = vmax.f32 %v769_v27, 0.0  ;;  %v1185_v40 = vpack.c.bf16 %v803_v30, %v803_v30 }
 0x111   : > { %v788_v37 = vadd.f32 %v1445_v46, %v749_v33  ;;  %v770_v38 = vadd.f32 %v1445_v46, %v731_v34  ;;  %v747_v39 = vld [vmem:[#allocation2 + $0xe8] sm:$0xff]  ;;  %v817_v41 = vmax.f32 %v785_v31, 0.0  ;;  %v1201_v44 = vpack.c.bf16 %v819_v35, %v819_v35 }
 0x112   : > { %v804_v42 = vmax.f32 %v772_v32, 0.0  ;;  %v786_v43 = vadd.f32 %v1445_v46, %v747_v39  ;;  %v1183_v45 = vpack.c.bf16 %v801_v36, %v801_v36  ;;  %964 = vst.msk [vmem:[%s1462_s28 + $0x38] sm:$0xf] %vm949_vm2, %v1185_v40 }
 0x113   : > { %v820_v47 = vmax.f32 %v788_v37, 0.0  ;;  %v802_v48 = vmax.f32 %v770_v38, 0.0  ;;  %v1199_v49 = vpack.c.bf16 %v817_v41, %v817_v41  ;;  %980 = vst.msk [vmem:[%s1462_s28 + $0x78] sm:$0xf] %vm949_vm2, %v1201_v44 }
 0x114   : > { %v1186_v50 = vpack.c.bf16 %v804_v42, %v804_v42  ;;  %v818_v51 = vmax.f32 %v786_v43, 0.0  ;;  %962 = vst.msk [vmem:[%s1462_s28 + $0x30] sm:$0xf] %vm949_vm2, %v1183_v45 }
 0x115   : > { %v1202_v52 = vpack.c.bf16 %v820_v47, %v820_v47  ;;  %v1184_v53 = vpack.c.bf16 %v802_v48, %v802_v48  ;;  %978 = vst.msk [vmem:[%s1462_s28 + $0x70] sm:$0xf] %vm949_vm2, %v1199_v49 }
 0x116   : > { %965 = vst.msk [vmem:[%s1462_s28 + $0x3c] sm:$0xf] %vm949_vm2, %v1186_v50  ;;  %v1200_v46 = vpack.c.bf16 %v818_v51, %v818_v51 }
 0x117   : > { %981 = vst.msk [vmem:[%s1462_s28 + $0x7c] sm:$0xf] %vm949_vm2, %v1202_v52  ;;  %963 = vst.msk [vmem:[%s1462_s28 + $0x34] sm:$0xf] %vm949_vm2, %v1184_v53 }
 0x118   : > { %979 = vst.msk [vmem:[%s1462_s28 + $0x74] sm:$0xf] %vm949_vm2, %v1200_v46 }
 0x119 PF: > { %s13_s14 = sadd.s32 1, %s1321_s14   ;;  %s1588_s12 = smov %s1317_s13 }
 0x11a   : > { %p10_p5 = scmp.ge.s32.totalorder %s13_s14, 4   ;;  %s1589_s13 = smov %s1591_s15 }
 0x11c   :  { %12 = sbr.rel (!%p10_p5) target bundleno = 2 (0x2), region = 76 }

</bundles_post_ra>
